<compile_context>
chip_gen: v5e
topology: v5e:2x2
jax: 0.10.0
libtpu: 0.0.40
codegen_flags: <defaults>
</compile_context>

<pallas_src>
import functools

import numpy as np

import jax
import jax.numpy as jnp
from jax.experimental import pallas as pl
from jax.experimental.pallas import tpu as pltpu

NUM_CLASSES = 3


def _assembled_detector_kernel(x_ref, w_ref, b_ref, out_ref, *, num_detectors):
    """One tile of pixels (channel-major).

    x_ref   : [1, C_total, TM]   activations, pixels on the lane axis
    w_ref   : [3*D, C_total]     class-major packed 1x1-conv weights
    b_ref   : [3*D, 1]           class-major packed biases
    out_ref : [1, 3, TM]         logits of the minimum-entropy detector
    """
    D = num_detectors
    x = x_ref[0].astype(jnp.float32)                              # [C, TM]

    # Single MXU matmul computes all detectors' / classes' logits at once.
    logits = jnp.dot(w_ref[...], x, preferred_element_type=jnp.float32)
    logits = logits + b_ref[...]                                  # [3*D, TM]

    # Class-major planes: lg[c] is [D, TM].
    lg = [logits[c * D:(c + 1) * D, :] for c in range(NUM_CLASSES)]

    # Softmax-entropy over classes, vectorized across all detectors & lanes.
    m = lg[0]
    for c in range(1, NUM_CLASSES):
        m = jnp.maximum(m, lg[c])
    e = [jnp.exp(lg[c] - m) for c in range(NUM_CLASSES)]
    s = e[0]
    for c in range(1, NUM_CLASSES):
        s = s + e[c]
    wsum = lg[0] * e[0]
    for c in range(1, NUM_CLASSES):
        wsum = wsum + lg[c] * e[c]
    # ent = logsumexp(lg) - E_p[lg]  (== -sum p*log p), NaN-safe.
    ent = m + jnp.log(s) - wsum / s                               # [D, TM]

    # Running min over detectors; strict '<' keeps the FIRST minimum
    # (matches torch.argmin tie-breaking).
    best_ent = ent[0:1, :]
    best = [lg[c][0:1, :] for c in range(NUM_CLASSES)]
    for d in range(1, D):
        take = ent[d:d + 1, :] < best_ent
        best_ent = jnp.where(take, ent[d:d + 1, :], best_ent)
        best = [jnp.where(take, lg[c][d:d + 1, :], best[c])
                for c in range(NUM_CLASSES)]

    out_ref[0] = jnp.concatenate(best, axis=0).astype(out_ref.dtype)


def _pack_params(weights, biases, mapchannels):
    """Pack per-detector 1x1-conv params class-major on the host (NumPy)."""
    D = len(mapchannels)
    C_total = int(sum(mapchannels))
    w_packed = np.zeros((NUM_CLASSES * D, C_total), dtype=np.float32)
    b_packed = np.zeros((NUM_CLASSES * D, 1), dtype=np.float32)
    cp = 0
    for d, mc in enumerate(mapchannels):
        w_d = np.asarray(weights[d], dtype=np.float32).reshape(NUM_CLASSES, mc)
        b_d = np.asarray(biases[d], dtype=np.float32).reshape(NUM_CLASSES)
        for c in range(NUM_CLASSES):
            w_packed[c * D + d, cp:cp + mc] = w_d[c]
            b_packed[c * D + d, 0] = b_d[c]
        cp += mc
    return jnp.asarray(w_packed), jnp.asarray(b_packed)


def assembled_detector_pallas(x_nchw, weights, biases, mapchannels, *, tile_m=2048):
    """x_nchw: [B, sum(mapchannels), H, W] float32.

    weights[i]: [3, mapchannels[i]]  (1x1 conv weight, squeezed)
    biases[i] : [3]
    Returns   : [B, 3, H, W]
    """
    B, C_total, H, W = x_nchw.shape
    D = len(mapchannels)
    assert sum(mapchannels) == C_total
    HW = H * W

    w_packed, b_packed = _pack_params(weights, biases, mapchannels)

    # Channel-major view, pixels on the lane axis (no transpose).
    x3 = x_nchw.reshape(B, C_total, HW)

    # Tile size: multiple of 128, as large as useful, clamped both by a VMEM
    # budget (input + output double-buffered, plus ~6 fp32 temps per lane) and
    # by the padded HW so tiny inputs stay single-tile.
    vmem_budget = 24 << 20  # bytes, leave headroom under the scoped limit
    bytes_per_col = 4 * (2 * (C_total + NUM_CLASSES) + 6 * NUM_CLASSES * D)
    tile_cap = max(128, (vmem_budget // bytes_per_col) // 128 * 128)
    tile_m = max(128, min(tile_m, tile_cap, pl.cdiv(HW, 128) * 128))
    HW_pad = pl.cdiv(HW, tile_m) * tile_m
    if HW_pad != HW:
        x3 = jnp.pad(x3, ((0, 0), (0, 0), (0, HW_pad - HW)))

    kernel = functools.partial(_assembled_detector_kernel, num_detectors=D)

    out = pl.pallas_call(
        kernel,
        out_shape=jax.ShapeDtypeStruct((B, NUM_CLASSES, HW_pad), jnp.float32),
        grid_spec=pltpu.PrefetchScalarGridSpec(
            num_scalar_prefetch=0,
            grid=(B, HW_pad // tile_m),
            in_specs=[
                pl.BlockSpec((1, C_total, tile_m), lambda b, i: (b, 0, i)),
                pl.BlockSpec((NUM_CLASSES * D, C_total), lambda b, i: (0, 0)),
                pl.BlockSpec((NUM_CLASSES * D, 1), lambda b, i: (0, 0)),
            ],
            out_specs=pl.BlockSpec((1, NUM_CLASSES, tile_m), lambda b, i: (b, 0, i)),
        ),
        compiler_params=pltpu.CompilerParams(
            dimension_semantics=("parallel", "parallel")),
    )(x3, w_packed, b_packed)

    if HW_pad != HW:
        out = out[:, :, :HW]
    return out.reshape(B, NUM_CLASSES, H, W)


def _reference(x_nchw, weights, biases, mapchannels):
    """Pure-JAX reference mirroring the PyTorch forward (for verification)."""
    outs, ents = [], []
    cp = 0
    for i, mc in enumerate(mapchannels):
        xs = x_nchw[:, cp:cp + mc]                                   # [B, mc, H, W]
        cp += mc
        logits = jnp.einsum('bchw,oc->bohw', xs, weights[i]) + biases[i][None, :, None, None]
        p = jax.nn.softmax(logits, axis=1)
        ent = -jnp.sum(p * jnp.log(p), axis=1)                       # [B, H, W]
        outs.append(logits[:, None])                                 # [B, 1, 3, H, W]
        ents.append(ent[:, None])                                    # [B, 1, H, W]
    ents = jnp.concatenate(ents, axis=1)                             # [B, D, H, W]
    outs = jnp.concatenate(outs, axis=1)                             # [B, D, 3, H, W]
    min_args = jnp.argmin(ents, axis=1)                              # [B, H, W]
    onehot = jax.nn.one_hot(min_args, ents.shape[1], axis=1)         # [B, D, H, W]
    onehot = jnp.repeat(onehot[:, :, None], 3, axis=2)               # [B, D, 3, H, W]
    return jnp.sum(onehot * outs, axis=1)                            # [B, 3, H, W]


if __name__ == "__main__":
    mapchannels = [4, 4, 4]
    B, H, W = 2, 16, 16
    C_total = sum(mapchannels)

    key = jax.random.PRNGKey(0)
    kx, *kws = jax.random.split(key, 1 + 2 * len(mapchannels))

    x = jax.random.normal(kx, (B, C_total, H, W), dtype=jnp.float32)

    weights, biases = [], []
    for i, mc in enumerate(mapchannels):
        kw, kb = kws[2 * i], kws[2 * i + 1]
        weights.append(0.3 * jax.random.normal(kw, (3, mc), dtype=jnp.float32))
        biases.append(0.1 * jax.random.normal(kb, (3,), dtype=jnp.float32))

    out = assembled_detector_pallas(x, weights, biases, mapchannels)
    out = jax.block_until_ready(out)

    ref = _reference(x, weights, biases, mapchannels)
    assert out.shape == (B, 3, H, W)
    assert jnp.allclose(out, ref, atol=1e-5, rtol=1e-5), "mismatch vs reference"

    print("KERNEL_OK")
</pallas_src>

<mosaic_0001>
module attributes {stable_mosaic.version = 11 : i64} {
  func.func @_assembled_detector_kernel(%arg0: i32, %arg1: i32, %arg2: memref<1x12x256xf32, #tpu.memory_space<vmem>>, %arg3: memref<9x12xf32, #tpu.memory_space<vmem>>, %arg4: memref<9x1xf32, #tpu.memory_space<vmem>>, %arg5: memref<1x3x256xf32, #tpu.memory_space<vmem>>) attributes {dimension_semantics = [#tpu.dimension_semantics<parallel>, #tpu.dimension_semantics<parallel>], iteration_bounds = array<i64: 2, 1>, scalar_prefetch = 0 : i64, scratch_operands = 0 : i64, tpu.core_type = #tpu.core_type<tc>, window_params = [{transform_indices = @transform_0, window_bounds = array<i64: 1, 12, 256>}, {pipeline_mode = #tpu.pipeline_mode<synchronous>, transform_indices = @transform_1, window_bounds = array<i64: 9, 12>}, {pipeline_mode = #tpu.pipeline_mode<synchronous>, transform_indices = @transform_2, window_bounds = array<i64: 9, 1>}, {transform_indices = @transform_3, window_bounds = array<i64: 1, 3, 256>}]} {
    %c0 = arith.constant 0 : index
    %c0_0 = arith.constant 0 : index
    %c0_1 = arith.constant 0 : index
    %0 = vector.load %arg2[%c0, %c0_0, %c0_1] : memref<1x12x256xf32, #tpu.memory_space<vmem>>, vector<1x12x256xf32>
    %1 = vector.shape_cast %0 : vector<1x12x256xf32> to vector<12x256xf32>
    %c0_2 = arith.constant 0 : index
    %c0_3 = arith.constant 0 : index
    %2 = vector.load %arg3[%c0_2, %c0_3] : memref<9x12xf32, #tpu.memory_space<vmem>>, vector<9x12xf32>
    %cst = arith.constant dense<0.000000e+00> : vector<9x256xf32>
    %3 = tpu.matmul %2, %1, %cst {dimension_numbers = #tpu.dot_dimension_numbers<[1], [0], [0], [1], [0, 0, 1, 1], [], []>} : vector<9x12xf32>, vector<12x256xf32>, vector<9x256xf32> -> vector<9x256xf32>
    %c0_4 = arith.constant 0 : index
    %c0_5 = arith.constant 0 : index
    %4 = vector.load %arg4[%c0_4, %c0_5] : memref<9x1xf32, #tpu.memory_space<vmem>>, vector<9x1xf32>
    %5 = vector.broadcast %4 : vector<9x1xf32> to vector<9x256xf32>
    %6 = arith.addf %3, %5 : vector<9x256xf32>
    %7 = vector.extract_strided_slice %6 {offsets = [0, 0], sizes = [3, 256], strides = [1, 1]} : vector<9x256xf32> to vector<3x256xf32>
    %8 = vector.extract_strided_slice %6 {offsets = [3, 0], sizes = [3, 256], strides = [1, 1]} : vector<9x256xf32> to vector<3x256xf32>
    %9 = vector.extract_strided_slice %6 {offsets = [6, 0], sizes = [3, 256], strides = [1, 1]} : vector<9x256xf32> to vector<3x256xf32>
    %10 = arith.maximumf %7, %8 : vector<3x256xf32>
    %11 = arith.maximumf %10, %9 : vector<3x256xf32>
    %12 = arith.subf %7, %11 : vector<3x256xf32>
    %13 = math.exp %12 : vector<3x256xf32>
    %14 = arith.subf %8, %11 : vector<3x256xf32>
    %15 = math.exp %14 : vector<3x256xf32>
    %16 = arith.subf %9, %11 : vector<3x256xf32>
    %17 = math.exp %16 : vector<3x256xf32>
    %18 = arith.addf %13, %15 : vector<3x256xf32>
    %19 = arith.addf %18, %17 : vector<3x256xf32>
    %20 = arith.mulf %7, %13 : vector<3x256xf32>
    %21 = arith.mulf %8, %15 : vector<3x256xf32>
    %22 = arith.addf %20, %21 : vector<3x256xf32>
    %23 = arith.mulf %9, %17 : vector<3x256xf32>
    %24 = arith.addf %22, %23 : vector<3x256xf32>
    %25 = math.log %19 : vector<3x256xf32>
    %26 = arith.addf %11, %25 : vector<3x256xf32>
    %27 = arith.divf %24, %19 : vector<3x256xf32>
    %28 = arith.subf %26, %27 : vector<3x256xf32>
    %29 = vector.extract_strided_slice %28 {offsets = [0, 0], sizes = [1, 256], strides = [1, 1]} : vector<3x256xf32> to vector<1x256xf32>
    %30 = vector.extract_strided_slice %7 {offsets = [0, 0], sizes = [1, 256], strides = [1, 1]} : vector<3x256xf32> to vector<1x256xf32>
    %31 = vector.extract_strided_slice %8 {offsets = [0, 0], sizes = [1, 256], strides = [1, 1]} : vector<3x256xf32> to vector<1x256xf32>
    %32 = vector.extract_strided_slice %9 {offsets = [0, 0], sizes = [1, 256], strides = [1, 1]} : vector<3x256xf32> to vector<1x256xf32>
    %33 = vector.extract_strided_slice %28 {offsets = [1, 0], sizes = [1, 256], strides = [1, 1]} : vector<3x256xf32> to vector<1x256xf32>
    %34 = arith.cmpf olt, %33, %29 : vector<1x256xf32>
    %35 = vector.extract_strided_slice %28 {offsets = [1, 0], sizes = [1, 256], strides = [1, 1]} : vector<3x256xf32> to vector<1x256xf32>
    %36 = arith.select %34, %35, %29 : vector<1x256xi1>, vector<1x256xf32>
    %37 = vector.extract_strided_slice %7 {offsets = [1, 0], sizes = [1, 256], strides = [1, 1]} : vector<3x256xf32> to vector<1x256xf32>
    %38 = arith.select %34, %37, %30 : vector<1x256xi1>, vector<1x256xf32>
    %39 = vector.extract_strided_slice %8 {offsets = [1, 0], sizes = [1, 256], strides = [1, 1]} : vector<3x256xf32> to vector<1x256xf32>
    %40 = arith.select %34, %39, %31 : vector<1x256xi1>, vector<1x256xf32>
    %41 = vector.extract_strided_slice %9 {offsets = [1, 0], sizes = [1, 256], strides = [1, 1]} : vector<3x256xf32> to vector<1x256xf32>
    %42 = arith.select %34, %41, %32 : vector<1x256xi1>, vector<1x256xf32>
    %43 = vector.extract_strided_slice %28 {offsets = [2, 0], sizes = [1, 256], strides = [1, 1]} : vector<3x256xf32> to vector<1x256xf32>
    %44 = arith.cmpf olt, %43, %36 : vector<1x256xf32>
    %45 = vector.extract_strided_slice %7 {offsets = [2, 0], sizes = [1, 256], strides = [1, 1]} : vector<3x256xf32> to vector<1x256xf32>
    %46 = arith.select %44, %45, %38 : vector<1x256xi1>, vector<1x256xf32>
    %47 = vector.extract_strided_slice %8 {offsets = [2, 0], sizes = [1, 256], strides = [1, 1]} : vector<3x256xf32> to vector<1x256xf32>
    %48 = arith.select %44, %47, %40 : vector<1x256xi1>, vector<1x256xf32>
    %49 = vector.extract_strided_slice %9 {offsets = [2, 0], sizes = [1, 256], strides = [1, 1]} : vector<3x256xf32> to vector<1x256xf32>
    %50 = arith.select %44, %49, %42 : vector<1x256xi1>, vector<1x256xf32>
    %51 = tpu.concatenate %46, %48, %50 in 0 : vector<1x256xf32>, vector<1x256xf32>, vector<1x256xf32> -> vector<3x256xf32>
    %c0_6 = arith.constant 0 : index
    %c0_7 = arith.constant 0 : index
    %c0_8 = arith.constant 0 : index
    %52 = vector.load %arg5[%c0_6, %c0_7, %c0_8] : memref<1x3x256xf32, #tpu.memory_space<vmem>>, vector<1x3x256xf32>
    %53 = vector.shape_cast %52 : vector<1x3x256xf32> to vector<3x256xf32>
    %54 = vector.shape_cast %51 : vector<3x256xf32> to vector<1x3x256xf32>
    tpu.vector_store %arg5[%c0_6, %c0_7, %c0_8], %54 {strides = array<i32>} : memref<1x3x256xf32, #tpu.memory_space<vmem>>, vector<1x3x256xf32>,
    return
  }
  func.func @transform_0(%arg0: i32, %arg1: i32) -> (i32, i32, i32) {
    %c0_i32 = arith.constant 0 : i32
    %c0_i32_0 = arith.constant 0 : i32
    return %arg0, %c0_i32, %arg1 : i32, i32, i32
  }
  func.func @transform_1(%arg0: i32, %arg1: i32) -> (i32, i32) {
    %c0_i32 = arith.constant 0 : i32
    %c0_i32_0 = arith.constant 0 : i32
    %c0_i32_1 = arith.constant 0 : i32
    return %c0_i32, %c0_i32_0 : i32, i32
  }
  func.func @transform_2(%arg0: i32, %arg1: i32) -> (i32, i32) {
    %c0_i32 = arith.constant 0 : i32
    %c0_i32_0 = arith.constant 0 : i32
    %c0_i32_1 = arith.constant 0 : i32
    return %c0_i32, %c0_i32_0 : i32, i32
  }
  func.func @transform_3(%arg0: i32, %arg1: i32) -> (i32, i32, i32) {
    %c0_i32 = arith.constant 0 : i32
    %c0_i32_0 = arith.constant 0 : i32
    return %arg0, %c0_i32, %arg1 : i32, i32, i32
  }
}

</mosaic_0001>

<bundles_post_ra>
// kernel: tpu_custom_call.1
= control target key start
LH: loop header
LB: loop body
LE: loop exit
PB: predicated region body
PF: predicated region fallthrough
CT: control target
= control target key end

     0   :  { %s725_s12 = smov 0   ;;  %s727_s13 = smov 0   ;;  %s889_s0 = inlined_call_operand.vmem [shape: f32[2,12,256], index: 0, kind: input, shape index: {}]   ;;  %s890_s1 = inlined_call_operand.vmem [shape: f32[9,12], index: 1, kind: input, shape index: {}]   ;;  %s891_s2 = inlined_call_operand.vmem [shape: f32[9,1], index: 2, kind: input, shape index: {}]   ;;  %s892_s3 = inlined_call_operand.vmem [shape: f32[2,3,256], index: 3, kind: output, shape index: {}]  }
   0x1   :  { %s729_s14 = smov 0  }
   0x2 LB: > { %s25_s15 = sadd.s32 1, %s698_s13  ;;  %p611_p0 = scmp.ge.s32.totalorder %s702_s14, 1  ;;  %s702_s14 = sphi %s729_s14, %s13_s14   ;;  %s698_s13 = sphi %s727_s13, %s898_s13   ;;  %s694_s12 = sphi %s725_s12, %s897_s12  }
   0x3   : > { %p27_p1 = scmp.ge.s32.totalorder %s25_s15, 2  ;;  %p158_p2 = scmp.lt.s32.totalorder %s702_s14, 3 }
   0x5   : > { %s900_s15 = smov (%p27_p1, %s25_s15), 0  ;;  %p159_p3 = pnand %p611_p0, %p158_p2 }
   0x6   : > { %p191_p4 = scmp.lt.s32.totalorder (!%p159_p3), %s694_s12, 1 }
   0x7   : > { %162 = sbr.rel (%p159_p3) target bundleno = 219 (0xdb), region = 32 }
   0xc   : > { %v216_v0 = vld [vmem:[%s891_s2] sm:$0xff]  ;;  %v704_v1 = vmov 0   ;;  %s902_s12 = smov (!%p191_p4, %s694_s12), 1  ;;  %vm235_vm0 = vcmask 1043456   ;;  %vm228_vm1 = vcmask 97280   ;;  %vm298_vm2 = vcmask 1041408  }
   0xd   : > { %655 = vset.pattern.permute.xlu0 %v704_v1  ;;  %s624_s18 = sshll.u32 %s902_s12, 5  ;;  %v214_v6 = vld [vmem:[%s890_s1] sm:$0xff]  ;;  %v215_v7 = vld [vmem:[%s890_s1 + $0x8] sm:$0x1]  ;;  %vm509_vm15 = vcmask 1040384   ;;  %s625_s28 = sshll.u32 %s902_s12, 3 }
   0xe   : > { %220 = vperm.xlu0 %655, %v216_v0   ;;  %s198_s21 = scalar_lea.vmem %s889_s0, %s624_s18  ;;  %v217_v8 = vld [vmem:[%s891_s2 + $0x8] sm:$0x1]  ;;  %s208_s4 = scalar_lea.vmem %s892_s3, %s625_s28 }
   0xf   : > { %v212_v2 = vld [vmem:[%s198_s21 + $0x10] sm:$0xf]  ;;  %v213_v3 = vld [vmem:[%s198_s21 + $0x18] sm:$0xf]  ;;  %v210_v4 = vld [vmem:[%s198_s21] sm:$0xff] }
  0x10   : > { %616 = vmatpush.msk.msra.mxu0 %vm235_vm0, %v212_v2  ;;  %626 = vmatpush.msk.msra.mxu2 %vm235_vm0, %v212_v2  ;;  %v211_v5 = vld [vmem:[%s198_s21 + $0x8] sm:$0xff] }
  0x11   : > { %619 = vmatpush.msk.msra.mxu1 %vm235_vm0, %v213_v3  ;;  %628 = vmatpush.msk.msra.mxu3 %vm235_vm0, %v213_v3 }
  0x12   : > { %257 = vmatpush.msra.mxu0 %v210_v4  ;;  %627 = vmatpush.msra.mxu2 %v210_v4 }
  0x13   : > { %280 = vmatpush.msra.mxu1 %v211_v5  ;;  %629 = vmatpush.msra.mxu3 %v211_v5 }
  0x14   : > { %617 = vmatmul.msk.f32.vlgmr.msra.gmra.mxu0 %vm228_vm1, %v214_v6  ;;  %618 = vmatmul.msk.f32.vlgmr.msra.gmra.mxu2 %vm228_vm1, %v215_v7 }
  0x15   : > { %620 = vmatmul.msk.f32.vlgmr.msra.gmra.mxu1 %vm228_vm1, %v214_v6  ;;  %621 = vmatmul.msk.f32.vlgmr.msra.gmra.mxu3 %vm228_vm1, %v215_v7 }
  0x16   : > { %225 = vperm.xlu0 %655, %v217_v8  }
  0x80   : > { %v221_v9 = vpop.permute.xlu0 %220 }
  0x88   : > { %v226_v14 = vpop.permute.xlu0 %225 }
  0x91   : > { %v259_v10 = vpop.f32.mrf.mxu0 }
  0x92   : > { %v282_v11 = vpop.f32.mrf.mxu1  ;;  %v765_v12 = vadd.f32 %v259_v10, %v221_v9 }
  0x93   : > { %v767_v13 = vadd.f32 %v282_v11, %v221_v9 }
  0x94   : > { %v770_v16 = vrot.slane %v765_v12, 3  ;;  %v299_v21 = vrot.slane %v765_v12, 6 }
  0x95   : > { %v775_v19 = vrot.slane %v767_v13, 3  ;;  %v302_v24 = vrot.slane %v767_v13, 6 }
  0x96   : > { %v294_v23 = vmax.f32 %v765_v12, %v770_v16 }
  0x97   : > { %v262_v15 = vpop.f32.mrf.mxu2  ;;  %v295_v27 = vmax.f32 %v767_v13, %v775_v19 }
  0x98   : > { %v772_v17 = vadd.f32 %v262_v15, %v226_v14  ;;  %v285_v18 = vpop.f32.mrf.mxu3 }
  0x99   : > { %v777_v20 = vadd.f32 %v285_v18, %v226_v14 }
  0x9a   : > { %v300_v22 = vrot.slane %v772_v17, 6 }
  0x9b   : > { %v303_v25 = vrot.slane %v777_v20, 6 }
  0x9c   : > { %v301_v26 = vsel %vm298_vm2, %v299_v21, %v300_v22 }
  0x9d   : > { %v792_v28 = vmax.f32 %v294_v23, %v301_v26  ;;  %v304_v29 = vsel %vm298_vm2, %v302_v24, %v303_v25 }
  0x9e   : > { %v799_v30 = vmax.f32 %v295_v27, %v304_v29 }
  0x9f   : > { %v309_v31 = vsub.f32 %v765_v12, %v792_v28  ;;  %v317_v32 = vrot.slane %v792_v28, 5  ;;  %v327_v33 = vrot.slane %v792_v28, 2 }
  0xa0   : > { %v310_v34 = vsub.f32 %v767_v13, %v799_v30  ;;  %v318_v35 = vrot.slane %v799_v30, 5  ;;  %v328_v36 = vrot.slane %v799_v30, 2 }
  0xa1   : > { %v311_v37 = vmul.f32 1.442695, %v309_v31  ;;  %v321_v38 = vsub.f32 %v765_v12, %v317_v32  ;;  %v331_v39 = vsub.f32 %v765_v12, %v327_v33  ;;  %v333_v40 = vsub.f32 %v772_v17, %v327_v33 }
  0xa2   : > { %v313_v41 = vmul.f32 1.442695, %v310_v34  ;;  %v322_v42 = vsub.f32 %v767_v13, %v318_v35  ;;  %v332_v43 = vsub.f32 %v767_v13, %v328_v36  ;;  %v334_v44 = vsub.f32 %v777_v20, %v328_v36 }
  0xa3   : > { %656 = vpow2.f32 %v311_v37  ;;  %v323_v45 = vmul.f32 1.442695, %v321_v38  ;;  %v335_v46 = vmul.f32 1.442695, %v331_v39  ;;  %v339_v47 = vmul.f32 1.442695, %v333_v40 }
  0xa4   : > { %658 = vpow2.f32 %v313_v41  ;;  %v325_v48 = vmul.f32 1.442695, %v322_v42  ;;  %v337_v49 = vmul.f32 1.442695, %v332_v43  ;;  %v341_v50 = vmul.f32 1.442695, %v334_v44 }
  0xa5   : > { %660 = vpow2.f32 %v323_v45 }
  0xa6   : > { %662 = vpow2.f32 %v335_v46 }
  0xa7   : > { %664 = vpow2.f32 %v339_v47 }
  0xa8   : > { %666 = vpow2.f32 %v325_v48 }
  0xa9   : > { %v657_v51 = vpop.eup %656  ;;  %668 = vpow2.f32 %v337_v49 }
  0xaa   : > { %v659_v52 = vpop.eup %658  ;;  %670 = vpow2.f32 %v341_v50  ;;  %v365_v18 = vmul.f32 %v657_v51, %v765_v12 }
  0xab   : > { %v661_v53 = vpop.eup %660  ;;  %v366_v42 = vmul.f32 %v659_v52, %v767_v13 }
  0xac   : > { %v663_v54 = vpop.eup %662  ;;  %v345_v55 = vrot.slane %v661_v53, 3  ;;  %v367_v5 = vmul.f32 %v661_v53, %v765_v12 }
  0xad   : > { %v665_v56 = vpop.eup %664  ;;  %v355_v57 = vrot.slane %v663_v54, 6  ;;  %v377_v7 = vmul.f32 %v663_v54, %v765_v12 }
  0xae   : > { %v667_v58 = vpop.eup %666  ;;  %v349_v59 = vadd.f32 %v657_v51, %v345_v55  ;;  %v356_v60 = vrot.slane %v665_v56, 6  ;;  %v379_v8 = vmul.f32 %v665_v56, %v772_v17  ;;  %v371_v10 = vrot.slane %v367_v5, 3 }
  0xaf   : > { %v669_v61 = vpop.eup %668  ;;  %v346_v62 = vrot.slane %v667_v58, 3  ;;  %v385_v11 = vrot.slane %v377_v7, 6  ;;  %v368_v23 = vmul.f32 %v667_v58, %v767_v13  ;;  %v443_v5 = vrot.slane %v765_v12, 7 }
  0xb0   : > { %v671_v63 = vpop.eup %670  ;;  %v357_v0 = vsel %vm298_vm2, %v355_v57, %v356_v60  ;;  %v358_v1 = vrot.slane %v669_v61, 6  ;;  %v386_v14 = vrot.slane %v379_v8, 6  ;;  %v375_v27 = vadd.f32 %v371_v10, %v365_v18 }
  0xb1   : > { %v363_v2 = vadd.f32 %v357_v0, %v349_v59  ;;  %v350_v3 = vadd.f32 %v659_v52, %v346_v62  ;;  %v359_v4 = vrot.slane %v671_v63, 6  ;;  %v378_v29 = vmul.f32 %v669_v61, %v767_v13 }
  0xb2   : > { %v380_v31 = vmul.f32 %v671_v63, %v777_v20  ;;  %v387_v33 = vsel %vm298_vm2, %v385_v11, %v386_v14  ;;  %v372_v38 = vrot.slane %v368_v23, 3  ;;  %v444_v23 = vrot.slane %v767_v13, 7 }
  0xb3   : > { %672 = vrcp.f32 %v363_v2  ;;  %v360_v6 = vsel %vm298_vm2, %v358_v1, %v359_v4  ;;  %v410_v36 = vand.u32 2147483647, %v363_v2  ;;  %v412_v37 = vand.u32 2147483648, %v363_v2 }
  0xb4   : > { %v364_v9 = vadd.f32 %v360_v6, %v350_v3  ;;  %674 = vlog2.f32 %v363_v2  ;;  %v393_v41 = vadd.f32 %v387_v33, %v375_v27  ;;  %v388_v43 = vrot.slane %v378_v29, 6 }
  0xb5   : > { %v389_v44 = vrot.slane %v380_v31, 6  ;;  %vm406_vm4 = vweird.f32 %v363_v2  ;;  %vm411_vm6 = vcmp.eq.f32.partialorder %v410_v36, 8.507059e+37  ;;  %v413_v49 = vor.u32 1.1754944e-38, %v412_v37 }
  0xb6   : > { %676 = vrcp.f32 %v364_v9  ;;  %v376_v50 = vadd.f32 %v372_v38, %v366_v42  ;;  %v427_v51 = vand.u32 2147483648, %v364_v9  ;;  %v425_v55 = vand.u32 2147483647, %v364_v9 }
  0xb7   : > { %678 = vlog2.f32 %v364_v9  ;;  %v390_v57 = vsel %vm298_vm2, %v388_v43, %v389_v44  ;;  %vm421_vm8 = vweird.f32 %v364_v9  ;;  %v449_v6 = vrot.slane %v765_v12, 2 }
  0xb8   : > { %v428_v61 = vor.u32 1.1754944e-38, %v427_v51  ;;  %v394_v63 = vadd.f32 %v390_v57, %v376_v50  ;;  %vm426_vm10 = vcmp.eq.f32.partialorder %v425_v55, 8.507059e+37  ;;  %v450_v27 = vrot.slane %v767_v13, 2 }
  0xb9   : > { %v673_v15 = vpop.eup %672  ;;  %v458_v29 = vrot.slane %v767_v13, 5 }
  0xba   : > { %v402_v26 = vmul.f32 %v673_v15, %v363_v2  ;;  %v675_v32 = vpop.eup %674  ;;  %vm407_vm3 = vweird.f32 %v673_v15 }
  0xbb   : > { %v396_v45 = vmul.f32 0.6931472, %v675_v32  ;;  %vm408_vm5 = vmor %vm406_vm4, %vm407_vm3 }
  0xbc   : > { %v403_v34 = vsub.f32 1.0, %v402_v26  ;;  %v677_v35 = vpop.eup %676  ;;  %v457_v26 = vrot.slane %v765_v12, 5 }
  0xbd   : > { %v417_v40 = vmul.f32 %v677_v35, %v364_v9  ;;  %v679_v48 = vpop.eup %678  ;;  %vm422_vm7 = vweird.f32 %v677_v35  ;;  %v399_v52 = vadd.f32 %v396_v45, %v792_v28 }
  0xbe   : > { %v404_v39 = vmul.f32 %v673_v15, %v403_v34  ;;  %v398_v59 = vmul.f32 0.6931472, %v679_v48  ;;  %vm423_vm9 = vmor %vm421_vm8, %vm422_vm7 }
  0xbf   : > { %v418_v47 = vsub.f32 1.0, %v417_v40 }
  0xc0   : > { %v405_v46 = vadd.f32 %v673_v15, %v404_v39  ;;  %v400_v3 = vadd.f32 %v398_v59, %v799_v30 }
  0xc1   : > { %v419_v54 = vmul.f32 %v677_v35, %v418_v47 }
  0xc2   : > { %v409_v53 = vsel %vm408_vm5, %v673_v15, %v405_v46 }
  0xc3   : > { %v414_v56 = vsel %vm411_vm6, %v413_v49, %v409_v53  ;;  %v420_v60 = vadd.f32 %v677_v35, %v419_v54 }
  0xc4   : > { %v415_v58 = vmul.f32 %v414_v56, %v393_v41 }
  0xc5   : > { %v424_v0 = vsel %vm423_vm9, %v677_v35, %v420_v60 }
  0xc6   : > { %v431_v62 = vsub.f32 %v399_v52, %v415_v58  ;;  %v429_v1 = vsel %vm426_vm10, %v428_v61, %v424_v0 }
  0xc7   : > { %v430_v4 = vmul.f32 %v429_v1, %v394_v63 }
  0xc8   : > { %v435_v2 = vrot.slane %v431_v62, 7 }
  0xc9   : > { %v432_v7 = vsub.f32 %v400_v3, %v430_v4 }
  0xca   : > { %vm831_vm11 = vcmp.lt.f32.partialorder %v431_v62, %v435_v2 }
  0xcb   : > { %v441_v8 = vsel %vm831_vm11, %v431_v62, %v435_v2  ;;  %v447_v9 = vsel %vm831_vm11, %v765_v12, %v443_v5  ;;  %v453_v30 = vsel %vm831_vm11, %v770_v16, %v449_v6  ;;  %v436_v15 = vrot.slane %v432_v7, 7 }
  0xcc   : > { %v465_v10 = vrot.slane %v441_v8, 7  ;;  %v473_v11 = vrot.slane %v447_v9, 7  ;;  %v481_v14 = vrot.slane %v453_v30, 7  ;;  %v461_v39 = vsel %vm831_vm11, %v299_v21, %v457_v26 }
  0xcd   : > { %vm440_vm13 = vcmp.lt.f32.partialorder %v432_v7, %v436_v15  ;;  %v491_v45 = vrot.slane %v461_v39, 7 }
  0xce   : > { %vm843_vm12 = vcmp.lt.f32.partialorder %v431_v62, %v465_v10  ;;  %v442_v33 = vsel %vm440_vm13, %v432_v7, %v436_v15  ;;  %v448_v34 = vsel %vm440_vm13, %v767_v13, %v444_v23  ;;  %v454_v35 = vsel %vm440_vm13, %v775_v19, %v450_v27 }
  0xcf   : > { %v477_v31 = vsel %vm843_vm12, %v765_v12, %v473_v11  ;;  %v485_v32 = vsel %vm843_vm12, %v770_v16, %v481_v14  ;;  %v462_v36 = vsel %vm440_vm13, %v302_v24, %v458_v29  ;;  %v466_v37 = vrot.slane %v442_v33, 7 }
  0xd0   : > { %v474_v38 = vrot.slane %v448_v34, 7  ;;  %v482_v40 = vrot.slane %v454_v35, 7  ;;  %v499_v41 = vrot.slane %v477_v31, 2  ;;  %v505_v42 = vrot.slane %v485_v32, 1 }
  0xd1   : > { %vm470_vm14 = vcmp.lt.f32.partialorder %v432_v7, %v466_v37  ;;  %v492_v16 = vrot.slane %v462_v36, 7 }
  0xd2   : > { %v478_v43 = vsel %vm470_vm14, %v767_v13, %v474_v38  ;;  %v486_v44 = vsel %vm470_vm14, %v775_v19, %v482_v40  ;;  %v510_v47 = vsel %vm509_vm15, %v499_v41, %v505_v42  ;;  %v495_v13 = vsel %vm843_vm12, %v300_v22, %v491_v45 }
  0xd3   : > { %v500_v46 = vrot.slane %v478_v43, 2  ;;  %v506_v24 = vrot.slane %v486_v44, 1  ;;  %v496_v12 = vsel %vm470_vm14, %v303_v25, %v492_v16  ;;  %v512_v49 = vsel %vm298_vm2, %v510_v47, %v495_v13 }
  0xd5   : > { %v511_v48 = vsel %vm509_vm15, %v500_v46, %v506_v24 }
  0xd6   : > { %v513_v21 = vsel %vm298_vm2, %v511_v48, %v496_v12 }
  0xd7   : > { %v516_v19 = vrot.slane %v513_v21, 4 }
  0xd9   : > { %v517_v50 = vsel %vm235_vm0, %v512_v49, %v516_v19 }
  0xda   : > { %519 = vst [vmem:[%s208_s4] sm:$0x77] %v517_v50 }
  0xdb PF: > { %s13_s14 = sadd.s32 1, %s702_s14   ;;  %s897_s12 = smov %s698_s13 }
  0xdc   : > { %p10_p5 = scmp.ge.s32.totalorder %s13_s14, 4   ;;  %s898_s13 = smov %s900_s15 }
  0xde   :  { %12 = sbr.rel (!%p10_p5) target bundleno = 2 (0x2), region = 62 }

</bundles_post_ra>
